<compile_context>
chip_gen: v6e
topology: v6e:2x2x1
jax: 0.10.0
libtpu: 0.0.40
codegen_flags: <defaults>
</compile_context>

<pallas_src>
import numpy as np
import jax
import jax.numpy as jnp
from jax.experimental import pallas as pl
from jax.experimental.pallas import tpu as pltpu


_GRAY_R, _GRAY_G, _GRAY_B = 0.2989, 0.587, 0.114
_MAX_ROW_TILE = 256          # (1, 3, 256, 128) f32 block = 384 KiB


# ------------------------------ kernel body -------------------------------- #

def _hue_shift(r, g, b, hue):
    """torchvision adjust_hue math (rgb->hsv, shift, hsv->rgb) on f32 planes."""
    maxc = jnp.maximum(jnp.maximum(r, g), b)
    minc = jnp.minimum(jnp.minimum(r, g), b)
    eqc = maxc == minc
    cr = maxc - minc
    ones = jnp.ones_like(maxc)
    # one EUP reciprocal reused for rc/gc/bc instead of three full divides
    s = cr * pl.reciprocal(jnp.where(eqc, ones, maxc), approx=True)
    inv_cr = pl.reciprocal(jnp.where(eqc, ones, cr), approx=True)
    rc = (maxc - r) * inv_cr
    gc = (maxc - g) * inv_cr
    bc = (maxc - b) * inv_cr
    hr = jnp.where(maxc == r, bc - gc, 0.0)
    hg = jnp.where((maxc == g) & (maxc != r), 2.0 + rc - bc, 0.0)
    hb = jnp.where((maxc != g) & (maxc != r), 4.0 + gc - rc, 0.0)
    h = jnp.mod((hr + hg + hb) * (1.0 / 6.0) + 1.0, 1.0)
    v = maxc

    h = jnp.mod(h + hue, 1.0)

    hp = h * 6.0
    i_f = jnp.floor(hp)
    f = hp - i_f
    i_f = jnp.where(i_f >= 6.0, 0.0, i_f)      # hp == 6.0 edge case (== '% 6')
    p = jnp.clip(v * (1.0 - s), 0.0, 1.0)
    q = jnp.clip(v * (1.0 - s * f), 0.0, 1.0)
    t = jnp.clip(v * (1.0 - s * (1.0 - f)), 0.0, 1.0)

    def sel(vals):
        out = vals[5]
        for k in range(4, -1, -1):
            out = jnp.where(i_f == float(k), vals[k], out)
        return out

    return (sel((v, q, p, p, t, v)),
            sel((t, v, v, q, p, p)),
            sel((p, p, t, v, v, q)))


def _make_fused_kernel(op_seq):
    """Kernel applying `op_seq` (tuple of op ids) in order.

    op ids: 0=brightness, 1=contrast, 2=saturation, 3=hue.
    """
    op_seq = tuple(int(o) for o in op_seq)

    def kernel(rates_ref, means_ref, x_ref, o_ref):
        x = x_ref[...].astype(jnp.float32)        # (1, 3, R, 128)
        r, g, b = x[0, 0], x[0, 1], x[0, 2]

        for op in op_seq:                          # statically unrolled
            rate = rates_ref[op]
            if op == 0:                            # brightness
                r = jnp.clip(r * rate, 0.0, 1.0)
                g = jnp.clip(g * rate, 0.0, 1.0)
                b = jnp.clip(b * rate, 0.0, 1.0)
            elif op == 1:                          # contrast (mean hoisted to wrapper)
                blend = (1.0 - rate) * means_ref[pl.program_id(0)]
                r = jnp.clip(rate * r + blend, 0.0, 1.0)
                g = jnp.clip(rate * g + blend, 0.0, 1.0)
                b = jnp.clip(rate * b + blend, 0.0, 1.0)
            elif op == 2:                          # saturation
                gray = (1.0 - rate) * (_GRAY_R * r + _GRAY_G * g + _GRAY_B * b)
                r = jnp.clip(rate * r + gray, 0.0, 1.0)
                g = jnp.clip(rate * g + gray, 0.0, 1.0)
                b = jnp.clip(rate * b + gray, 0.0, 1.0)
            else:                                  # hue
                r, g, b = _hue_shift(r, g, b, rate)

        dt = o_ref.dtype
        o_ref[0, 0, :, :] = r.astype(dt)           # per-channel stores, no stack
        o_ref[0, 1, :, :] = g.astype(dt)
        o_ref[0, 2, :, :] = b.astype(dt)

    return kernel


# --------------------------- pallas call wrapper ---------------------------- #

_CALL_CACHE = {}


def _fused_pallas_call(op_seq, nb, c, rows, row_tile, dtype):
    key = (tuple(op_seq), nb, c, rows, row_tile, jnp.dtype(dtype).name)
    fn = _CALL_CACHE.get(key)
    if fn is None:
        kernel = _make_fused_kernel(op_seq)
        fn = jax.jit(pl.pallas_call(
            kernel,
            out_shape=jax.ShapeDtypeStruct((nb, c, rows, 128), dtype),
            grid=(nb, rows // row_tile),
            in_specs=[
                pl.BlockSpec(memory_space=pltpu.MemorySpace.SMEM),   # rates (4,) f32
                pl.BlockSpec(memory_space=pltpu.MemorySpace.SMEM),   # means (nb,) f32
                pl.BlockSpec((1, c, row_tile, 128), lambda i, t: (i, 0, t, 0)),
            ],
            out_specs=pl.BlockSpec((1, c, row_tile, 128),
                                   lambda i, t: (i, 0, t, 0)),
            compiler_params=pltpu.CompilerParams(
                dimension_semantics=("parallel", "parallel"),
                vmem_limit_bytes=32 * 1024 * 1024),
        ))
        _CALL_CACHE[key] = fn
    return fn


def apply_color_jitter(images, ops):
    """Apply an ordered list of (op_id, rate) jitter ops to NCHW RGB images."""
    if not ops:
        return images
    n, c, h, w = images.shape
    assert c == 3, "color jitter requires 3-channel RGB input"
    orig_dtype = images.dtype
    hw = h * w

    # lane-dense layout: (N, 3, rows, 128), rows padded to the row tile
    rows = pl.cdiv(hw, 128)
    if rows <= _MAX_ROW_TILE:
        row_tile = rows                       # block == full dim (allowed)
        rows_padded = rows
    else:
        row_tile = _MAX_ROW_TILE              # multiple of 8
        rows_padded = pl.cdiv(rows, row_tile) * row_tile
    p_padded = rows_padded * 128

    x = images.reshape(n, c, hw).astype(jnp.float32)
    if p_padded != hw:
        x = jnp.pad(x, ((0, 0), (0, 0), (0, p_padded - hw)))
    x = x.reshape(n, c, rows_padded, 128)

    rates_np = np.zeros((4,), np.float32)
    for op_id, rate in ops:
        rates_np[op_id] = rate
    rates = jnp.asarray(rates_np)

    op_ids = tuple(int(op_id) for op_id, _ in ops)
    # contrast needs the whole-image grayscale mean of the *current* image
    # state, so split the fused pipeline at the contrast op.
    if 1 in op_ids:
        k = op_ids.index(1)
        segments = [s for s in (op_ids[:k], op_ids[k:]) if s]
    else:
        segments = [op_ids]

    zero_means = jnp.zeros((n,), jnp.float32)
    for seg in segments:
        if 1 in seg:
            cur = x.reshape(n, c, p_padded)[:, :, :hw]
            gray = _GRAY_R * cur[:, 0] + _GRAY_G * cur[:, 1] + _GRAY_B * cur[:, 2]
            means = jnp.mean(gray, axis=-1).astype(jnp.float32)
        else:
            means = zero_means
        call = _fused_pallas_call(seg, n, c, rows_padded, row_tile, jnp.float32)
        x = call(rates, means, x)

    out = x.reshape(n, c, p_padded)[:, :, :hw].reshape(n, c, h, w)
    return out.astype(orig_dtype)


def adjust_brightness(img, rate):
    return apply_color_jitter(img, [(0, float(rate))])


def adjust_contrast(img, rate):
    return apply_color_jitter(img, [(1, float(rate))])


def adjust_saturation(img, rate):
    return apply_color_jitter(img, [(2, float(rate))])


def adjust_hue(img, rate):
    return apply_color_jitter(img, [(3, float(rate))])


# ------------------------------ module port --------------------------------- #

class RandomColorjitter:
    """Pallas/JAX port of the PyTorch RandomColorjitter module."""

    def __init__(self, brightness=0.2, contrast=0.2, saturation=0.2, hue=0.2,
                 p=0.5, seed=0):
        self.p = p
        self.brightness = brightness
        self.contrast = contrast
        self.saturation = saturation
        self.hue = hue
        # TODO(synk): torch.randperm / np.random.random are host RNG with no
        # in-kernel equivalent; replicated deterministically with numpy here.
        self._rng = np.random.default_rng(seed)
        self.last_ops = []

    def _sample_ops(self):
        # Mirrors the original control flow (one gate draw per `if`, one rate
        # draw per applied op); collects (op_id, rate) so everything fuses.
        idx = self._rng.permutation(4)
        ops = []
        for i in idx:
            if self._rng.random() < self.p and i == 0:
                ops.append((0, float(1.0 + self._rng.random() / 2.5 - 0.2)))
            if self._rng.random() < self.p and i == 1:
                ops.append((1, float(1.0 + self._rng.random() / 2.5 - 0.2)))
            if self._rng.random() < self.p and i == 2:
                ops.append((2, float(1.0 + self._rng.random() / 2.5 - 0.2)))
            if self._rng.random() < self.p and i == 3:
                ops.append((3, float(self._rng.random() / 2.5 - 0.2)))
        return ops

    def __call__(self, prev_image, after_image, label_image):
        ops = self._sample_ops()
        self.last_ops = ops
        if not ops:
            return prev_image, after_image, label_image
        if (prev_image.shape == after_image.shape
                and prev_image.dtype == after_image.dtype):
            # one launch for both images (same rates)
            n_prev = prev_image.shape[0]
            both = jnp.concatenate([prev_image, after_image], axis=0)
            both = apply_color_jitter(both, ops)
            prev_image, after_image = both[:n_prev], both[n_prev:]
        else:
            prev_image = apply_color_jitter(prev_image, ops)
            after_image = apply_color_jitter(after_image, ops)
        return prev_image, after_image, label_image


# ------------------------- pure-JAX reference ------------------------------- #

def _reference_jitter(images, ops):
    img = images.astype(jnp.float32)
    for op_id, rate in ops:
        r, g, b = img[:, 0], img[:, 1], img[:, 2]
        gray = _GRAY_R * r + _GRAY_G * g + _GRAY_B * b            # (N, H, W)
        if op_id == 0:
            img = jnp.clip(img * rate, 0.0, 1.0)
        elif op_id == 1:
            mean = jnp.mean(gray, axis=(-2, -1), keepdims=True)[:, None]
            img = jnp.clip(rate * img + (1.0 - rate) * mean, 0.0, 1.0)
        elif op_id == 2:
            img = jnp.clip(rate * img + (1.0 - rate) * gray[:, None], 0.0, 1.0)
        else:
            maxc = jnp.maximum(jnp.maximum(r, g), b)
            minc = jnp.minimum(jnp.minimum(r, g), b)
            eqc = maxc == minc
            cr = maxc - minc
            ones = jnp.ones_like(maxc)
            s = cr / jnp.where(eqc, ones, maxc)
            cr_div = jnp.where(eqc, ones, cr)
            rc = (maxc - r) / cr_div
            gc = (maxc - g) / cr_div
            bc = (maxc - b) / cr_div
            hr = jnp.where(maxc == r, bc - gc, 0.0)
            hg = jnp.where((maxc == g) & (maxc != r), 2.0 + rc - bc, 0.0)
            hb = jnp.where((maxc != g) & (maxc != r), 4.0 + gc - rc, 0.0)
            h = jnp.mod((hr + hg + hb) / 6.0 + 1.0, 1.0)
            h = jnp.mod(h + rate, 1.0)
            v = maxc
            hp = h * 6.0
            i = jnp.floor(hp).astype(jnp.int32) % 6
            f = hp - jnp.floor(hp)
            p = jnp.clip(v * (1.0 - s), 0.0, 1.0)
            q = jnp.clip(v * (1.0 - s * f), 0.0, 1.0)
            t = jnp.clip(v * (1.0 - s * (1.0 - f)), 0.0, 1.0)

            def sel(vals):
                out = vals[5]
                for k in range(4, -1, -1):
                    out = jnp.where(i == k, vals[k], out)
                return out

            img = jnp.stack([sel((v, q, p, p, t, v)),
                             sel((t, v, v, q, p, p)),
                             sel((p, p, t, v, v, q))], axis=1)
    return img


# --------------------------------- main -------------------------------------- #

if __name__ == "__main__":
    key = jax.random.PRNGKey(0)
    k1, k2, k3 = jax.random.split(key, 3)

    N, C, H, W = 2, 3, 16, 16
    prev_image = jax.random.uniform(k1, (N, C, H, W), dtype=jnp.float32)
    after_image = jax.random.uniform(k2, (N, C, H, W), dtype=jnp.float32)
    label_image = jax.random.uniform(k3, (N, 1, H, W), dtype=jnp.float32)

    # p=1.0 so every jitter op executes (both fused segments run).
    jitter = RandomColorjitter(p=1.0, seed=0)
    prev_out, after_out, label_out = jitter(prev_image, after_image, label_image)

    jax.block_until_ready(prev_out)
    jax.block_until_ready(after_out)
    jax.block_until_ready(label_out)

    assert prev_out.shape == prev_image.shape
    assert after_out.shape == after_image.shape
    assert label_out.shape == label_image.shape
    assert bool(jnp.all(jnp.isfinite(prev_out)))
    assert bool(jnp.all(jnp.isfinite(after_out)))

    # correctness vs pure-JAX reference of the same (sampled) op sequence
    ops = jitter.last_ops
    ref_prev = _reference_jitter(prev_image, ops)
    ref_after = _reference_jitter(after_image, ops)
    err = max(float(jnp.max(jnp.abs(prev_out - ref_prev))),
              float(jnp.max(jnp.abs(after_out - ref_after))))
    assert err < 2e-2, f"max abs error vs reference: {err}"

    print("KERNEL_OK")
</pallas_src>

<mosaic_0001>
module attributes {stable_mosaic.version = 11 : i64} {
  func.func @kernel(%arg0: i32, %arg1: i32, %arg2: memref<4xf32, #tpu.memory_space<smem>>, %arg3: memref<4xf32, #tpu.memory_space<smem>>, %arg4: memref<1x3x2x128xf32, #tpu.memory_space<vmem>>, %arg5: memref<1x3x2x128xf32, #tpu.memory_space<vmem>>) attributes {dimension_semantics = [#tpu.dimension_semantics<parallel>, #tpu.dimension_semantics<parallel>], iteration_bounds = array<i64: 4, 1>, scalar_prefetch = 0 : i64, scratch_operands = 0 : i64, tpu.core_type = #tpu.core_type<tc>, window_params = [{transform_indices = @transform_0, window_bounds = array<i64: 4>}, {transform_indices = @transform_1, window_bounds = array<i64: 4>}, {transform_indices = @transform_2, window_bounds = array<i64: 1, 3, 2, 128>}, {transform_indices = @transform_3, window_bounds = array<i64: 1, 3, 2, 128>}]} {
    %c0 = arith.constant 0 : index
    %c0_0 = arith.constant 0 : index
    %c0_1 = arith.constant 0 : index
    %c0_2 = arith.constant 0 : index
    %0 = vector.load %arg4[%c0, %c0_0, %c0_1, %c0_2] : memref<1x3x2x128xf32, #tpu.memory_space<vmem>>, vector<1x3x2x128xf32>
    %1 = vector.extract_strided_slice %0 {offsets = [0, 0, 0, 0], sizes = [1, 1, 2, 128], strides = [1, 1, 1, 1]} : vector<1x3x2x128xf32> to vector<1x1x2x128xf32>
    %2 = vector.shape_cast %1 : vector<1x1x2x128xf32> to vector<2x128xf32>
    %3 = vector.extract_strided_slice %0 {offsets = [0, 1, 0, 0], sizes = [1, 1, 2, 128], strides = [1, 1, 1, 1]} : vector<1x3x2x128xf32> to vector<1x1x2x128xf32>
    %4 = vector.shape_cast %3 : vector<1x1x2x128xf32> to vector<2x128xf32>
    %5 = vector.extract_strided_slice %0 {offsets = [0, 2, 0, 0], sizes = [1, 1, 2, 128], strides = [1, 1, 1, 1]} : vector<1x3x2x128xf32> to vector<1x1x2x128xf32>
    %6 = vector.shape_cast %5 : vector<1x1x2x128xf32> to vector<2x128xf32>
    %c2 = arith.constant 2 : index
    %7 = memref.load %arg2[%c2] : memref<4xf32, #tpu.memory_space<smem>>
    %cst = arith.constant 1.000000e+00 : f32
    %8 = arith.subf %cst, %7 : f32
    %cst_3 = arith.constant 2.989000e-01 : f32
    %9 = vector.broadcast %cst_3 : f32 to vector<2x128xf32>
    %10 = arith.mulf %9, %2 : vector<2x128xf32>
    %cst_4 = arith.constant 5.870000e-01 : f32
    %11 = vector.broadcast %cst_4 : f32 to vector<2x128xf32>
    %12 = arith.mulf %11, %4 : vector<2x128xf32>
    %13 = arith.addf %10, %12 : vector<2x128xf32>
    %cst_5 = arith.constant 1.140000e-01 : f32
    %14 = vector.broadcast %cst_5 : f32 to vector<2x128xf32>
    %15 = arith.mulf %14, %6 : vector<2x128xf32>
    %16 = arith.addf %13, %15 : vector<2x128xf32>
    %17 = vector.broadcast %8 : f32 to vector<2x128xf32>
    %18 = arith.mulf %17, %16 : vector<2x128xf32>
    %19 = vector.broadcast %7 : f32 to vector<2x128xf32>
    %20 = arith.mulf %19, %2 : vector<2x128xf32>
    %21 = arith.addf %20, %18 : vector<2x128xf32>
    %cst_6 = arith.constant 0.000000e+00 : f32
    %cst_7 = arith.constant 1.000000e+00 : f32
    %22 = vector.broadcast %cst_6 : f32 to vector<2x128xf32>
    %23 = arith.maximumf %22, %21 : vector<2x128xf32>
    %24 = vector.broadcast %cst_7 : f32 to vector<2x128xf32>
    %25 = arith.minimumf %24, %23 : vector<2x128xf32>
    %26 = vector.broadcast %7 : f32 to vector<2x128xf32>
    %27 = arith.mulf %26, %4 : vector<2x128xf32>
    %28 = arith.addf %27, %18 : vector<2x128xf32>
    %cst_8 = arith.constant 0.000000e+00 : f32
    %cst_9 = arith.constant 1.000000e+00 : f32
    %29 = vector.broadcast %cst_8 : f32 to vector<2x128xf32>
    %30 = arith.maximumf %29, %28 : vector<2x128xf32>
    %31 = vector.broadcast %cst_9 : f32 to vector<2x128xf32>
    %32 = arith.minimumf %31, %30 : vector<2x128xf32>
    %33 = vector.broadcast %7 : f32 to vector<2x128xf32>
    %34 = arith.mulf %33, %6 : vector<2x128xf32>
    %35 = arith.addf %34, %18 : vector<2x128xf32>
    %cst_10 = arith.constant 0.000000e+00 : f32
    %cst_11 = arith.constant 1.000000e+00 : f32
    %36 = vector.broadcast %cst_10 : f32 to vector<2x128xf32>
    %37 = arith.maximumf %36, %35 : vector<2x128xf32>
    %38 = vector.broadcast %cst_11 : f32 to vector<2x128xf32>
    %39 = arith.minimumf %38, %37 : vector<2x128xf32>
    %c0_12 = arith.constant 0 : index
    %40 = memref.load %arg2[%c0_12] : memref<4xf32, #tpu.memory_space<smem>>
    %41 = vector.broadcast %40 : f32 to vector<2x128xf32>
    %42 = arith.mulf %25, %41 : vector<2x128xf32>
    %cst_13 = arith.constant 0.000000e+00 : f32
    %cst_14 = arith.constant 1.000000e+00 : f32
    %43 = vector.broadcast %cst_13 : f32 to vector<2x128xf32>
    %44 = arith.maximumf %43, %42 : vector<2x128xf32>
    %45 = vector.broadcast %cst_14 : f32 to vector<2x128xf32>
    %46 = arith.minimumf %45, %44 : vector<2x128xf32>
    %47 = vector.broadcast %40 : f32 to vector<2x128xf32>
    %48 = arith.mulf %32, %47 : vector<2x128xf32>
    %cst_15 = arith.constant 0.000000e+00 : f32
    %cst_16 = arith.constant 1.000000e+00 : f32
    %49 = vector.broadcast %cst_15 : f32 to vector<2x128xf32>
    %50 = arith.maximumf %49, %48 : vector<2x128xf32>
    %51 = vector.broadcast %cst_16 : f32 to vector<2x128xf32>
    %52 = arith.minimumf %51, %50 : vector<2x128xf32>
    %53 = vector.broadcast %40 : f32 to vector<2x128xf32>
    %54 = arith.mulf %39, %53 : vector<2x128xf32>
    %cst_17 = arith.constant 0.000000e+00 : f32
    %cst_18 = arith.constant 1.000000e+00 : f32
    %55 = vector.broadcast %cst_17 : f32 to vector<2x128xf32>
    %56 = arith.maximumf %55, %54 : vector<2x128xf32>
    %57 = vector.broadcast %cst_18 : f32 to vector<2x128xf32>
    %58 = arith.minimumf %57, %56 : vector<2x128xf32>
    %c0_19 = arith.constant 0 : index
    %c0_20 = arith.constant 0 : index
    %c0_21 = arith.constant 0 : index
    %c0_22 = arith.constant 0 : index
    %59 = vector.load %arg5[%c0_19, %c0_20, %c0_21, %c0_22] : memref<1x3x2x128xf32, #tpu.memory_space<vmem>>, vector<1x1x2x128xf32>
    %60 = vector.shape_cast %59 : vector<1x1x2x128xf32> to vector<2x128xf32>
    %61 = vector.shape_cast %46 : vector<2x128xf32> to vector<1x1x2x128xf32>
    tpu.vector_store %arg5[%c0_19, %c0_20, %c0_21, %c0_22], %61 {strides = array<i32>} : memref<1x3x2x128xf32, #tpu.memory_space<vmem>>, vector<1x1x2x128xf32>,
    %c0_23 = arith.constant 0 : index
    %c1 = arith.constant 1 : index
    %c0_24 = arith.constant 0 : index
    %c0_25 = arith.constant 0 : index
    %62 = vector.load %arg5[%c0_23, %c1, %c0_24, %c0_25] : memref<1x3x2x128xf32, #tpu.memory_space<vmem>>, vector<1x1x2x128xf32>
    %63 = vector.shape_cast %62 : vector<1x1x2x128xf32> to vector<2x128xf32>
    %64 = vector.shape_cast %52 : vector<2x128xf32> to vector<1x1x2x128xf32>
    tpu.vector_store %arg5[%c0_23, %c1, %c0_24, %c0_25], %64 {strides = array<i32>} : memref<1x3x2x128xf32, #tpu.memory_space<vmem>>, vector<1x1x2x128xf32>,
    %c0_26 = arith.constant 0 : index
    %c2_27 = arith.constant 2 : index
    %c0_28 = arith.constant 0 : index
    %c0_29 = arith.constant 0 : index
    %65 = vector.load %arg5[%c0_26, %c2_27, %c0_28, %c0_29] : memref<1x3x2x128xf32, #tpu.memory_space<vmem>>, vector<1x1x2x128xf32>
    %66 = vector.shape_cast %65 : vector<1x1x2x128xf32> to vector<2x128xf32>
    %67 = vector.shape_cast %58 : vector<2x128xf32> to vector<1x1x2x128xf32>
    tpu.vector_store %arg5[%c0_26, %c2_27, %c0_28, %c0_29], %67 {strides = array<i32>} : memref<1x3x2x128xf32, #tpu.memory_space<vmem>>, vector<1x1x2x128xf32>,
    return
  }
  func.func @transform_0(%arg0: i32, %arg1: i32) -> i32 {
    %c0_i32 = arith.constant 0 : i32
    %c0_i32_0 = arith.constant 0 : i32
    return %c0_i32 : i32
  }
  func.func @transform_1(%arg0: i32, %arg1: i32) -> i32 {
    %c0_i32 = arith.constant 0 : i32
    %c0_i32_0 = arith.constant 0 : i32
    return %c0_i32 : i32
  }
  func.func @transform_2(%arg0: i32, %arg1: i32) -> (i32, i32, i32, i32) {
    %c0_i32 = arith.constant 0 : i32
    %c0_i32_0 = arith.constant 0 : i32
    %c0_i32_1 = arith.constant 0 : i32
    return %arg0, %c0_i32, %arg1, %c0_i32_0 : i32, i32, i32, i32
  }
  func.func @transform_3(%arg0: i32, %arg1: i32) -> (i32, i32, i32, i32) {
    %c0_i32 = arith.constant 0 : i32
    %c0_i32_0 = arith.constant 0 : i32
    %c0_i32_1 = arith.constant 0 : i32
    return %arg0, %c0_i32, %arg1, %c0_i32_0 : i32, i32, i32, i32
  }
}

</mosaic_0001>

<bundles_post_ra>
// kernel: tpu_custom_call.1
= control target key start
LH: loop header
LB: loop body
LE: loop exit
PB: predicated region body
PF: predicated region fallthrough
CT: control target
= control target key end

     0   :  { %s857_s0 = inlined_call_operand.hbm [shape: f32[4], index: 0, kind: input, shape index: {}]   ;;  %s858_s1 = inlined_call_operand.vmem [shape: f32[4], index: 1, kind: input, shape index: {}]   ;;  %s859_s2 = inlined_call_operand.hbm [shape: f32[4,3,2,128], index: 2, kind: input, shape index: {}]   ;;  %s860_s3 = inlined_call_operand.hbm [shape: f32[4,3,2,128], index: 3, kind: output, shape index: {}]  }
   0x1   :  { %862 = sst [smem:[#allocation14_spill]] %s857_s0 }
   0x2   :  { %8 = vsyncpa [#allocation5], 0 }
   0x3   :  { %9 = vsyncpa [#allocation6], 0 }
   0x4   :  { %10 = vsyncpa [#allocation3], 0 }
   0x5   :  { %12 = vsyncpa [#allocation3 + $0x1], 0 }
   0x6   :  { %13 = vsyncpa [#allocation4], 0 }
   0x7   :  { %15 = vsyncpa [#allocation4 + $0x1], 0  ;;  %s675_s12 = smov 0   ;;  %s677_s13 = smov 0  }
   0x8   :  { %s679_s14 = smov 0   ;;  %s681_s15 = smov 0  }
   0x9   :  { %s683_s16 = smov 0   ;;  %s685_s17 = smov 0  }
   0xa LB: > { %s396_s18 = sadd.s32 4294967295, %s645_s17   ;;  %s397_s19 = sadd.s32 4294967294, %s645_s17   ;;  %s645_s17 = sphi %s685_s17, %s21_s17   ;;  %s641_s16 = sphi %s683_s16, %s877_s16   ;;  %s637_s15 = sphi %s681_s15, %s876_s15   ;;  %s633_s14 = sphi %s679_s14, %s875_s14   ;;  %s629_s13 = sphi %s677_s13, %s874_s13   ;;  %s625_s12 = sphi %s675_s12, %s873_s12  }
   0xb   : > { %s84_s20 = sadd.s32 1, %s633_s14  ;;  %p91_p0 = scmp.ne.s32.totalorder %s633_s14, %s629_s13 }
   0xc   : > { %p92_p1 = scmp.eq.s32.totalorder %s645_s17, 0  ;;  %p97_p2 = scmp.ne.s32.totalorder %s629_s13, %s625_s12 }
   0xd   : > { %p713_p3 = scmp.eq.s32.totalorder %s396_s18, 0  ;;  %p123_p4 = scmp.eq.s32.totalorder %s396_s18, 3 }
   0xe   : > { %p93_p5 = por %p92_p1, %p91_p0  ;;  %p129_p6 = scmp.eq.s32.totalorder %s397_s19, 3 }
   0xf   : > { %p719_p7 = por %p713_p3, %p97_p2  ;;  %p723_p8 = por %p123_p4, %p91_p0 }
  0x10   : > { %p727_p9 = por %p129_p6, %p97_p2  ;;  %p398_p10 = scmp.ge.s32.totalorder %s645_s17, 1 }
  0x11   : > { %s865_s23 = scalar_select %p723_p8, 1, 0 }
  0x12   : > { %s866_s24 = scalar_select %p727_p9, 1, 0 }
  0x13   : > { %p136_p11 = scmp.lt.s32.totalorder %s645_s17, 5  ;;  %p445_p13 = scmp.lt.s32.totalorder %s645_s17, 4 }
  0x14   : > { %s158_s28 = sshll.u32 %s858_s1, 4  ;;  %s169_s4 = sand.u32 1, %s633_s14   ;;  %s159_s28 = int_to_ptr.vmem [resolvable:$true] %s158_s28 }
  0x15   : > { %p733_p12 = pnand %p398_p10, %p136_p11  ;;  %p743_p1 = pnand %p445_p13, %p93_p5 }
  0x16   : > { %s33_s5 = sadd.s32 1, %s641_s16  ;;  %s647_s6 = smov [#allocation2]  }
  0x17   : > { %p428_p0 = pneg %p733_p12  ;;  %s870_s0 = sld [smem:[#allocation14_spill]] }
  0x18   : > { %s514_s9 = scalar_lea.vmem %s159_s28, 16  ;;  %p522_p11 = scmp.lt.s32.totalorder %s159_s28, %s159_s28 }
  0x19   : > { %p749_p2 = pnand %p428_p0, %p713_p3  ;;  %p515_p4 = scmp.ne.s32.totalorder %s159_s28, %s514_s9 }
  0x1a   : > { %p523_p13 = scmp.lt.s32.totalorder %s514_s9, %s514_s9 }
  0x1b   : > { %p516_p5 = pneg %p749_p2 }
  0x1c   : > { %p524_p0 = por %p523_p13, %p522_p11 }
  0x1d   : > { %431 = dma.hbm_to_smem (!%p749_p2), %s870_s0, 16, %s647_s6, [#allocation5]  }
  0x1e   : > { %p517_p6 = pnand %p516_p5, %p515_p4 }
  0x20   : > { %p518_p10 = pneg %p517_p6 }
  0x22   : > { %p525_p9 = pnand %p524_p0, %p518_p10 }
  0x24   : > { %528 = shalt.err (!%p525_p9)
}
  0x25   : > { %s648_s10 = smov [#allocation7]   ;;  %p35_p8 = scmp.ge.s32.totalorder %s33_s5, 4 }
  0x26   : > { %434 = dma.vmem_to_smem (!%p749_p2), %s159_s28, 16, %s648_s10, [#allocation6]  }
  0x27   : > { %s412_s11 = smul.u32 6, %s169_s4  ;;  %s879_s5 = smov (%p35_p8, %s33_s5), 0 }
  0x28   : > { %s413_s18 = smul.u32 96, %s641_s16  ;;  %s79_s19 = ssub.s32 %s641_s16, %s879_s5 }
  0x29   : > { %s173_s26 = scalar_lea.vmem [#allocation8], %s412_s11  ;;  %p82_p4 = scmp.eq.s32.totalorder %s79_s19, 0 }
  0x2a   : > { %s181_s27 = sshll.u32 %s173_s26, 4  ;;  %s180_s30 = scalar_lea.hbm %s859_s2, %s413_s18  ;;  %s182_s27 = int_to_ptr.vmem [resolvable:$true] %s181_s27 }
  0x2b   : > { %s775_s8 = scalar_select %p82_p4, %s633_s14, %s84_s20  }
  0x2c   : > { %s170_s9 = scalar_lea.sflag [#allocation3], %s169_s4  ;;  %p531_p9 = pneg %p743_p1 }
  0x2d   : > { %s542_s28 = scalar_lea.vmem %s182_s27, 96  ;;  %s649_s10 = smov [#allocation8]  }
  0x2e   : > { %p543_p8 = scmp.ne.s32.totalorder %s182_s27, %s542_s28  ;;  %s547_s0 = sshll.u32 %s649_s10, 4  ;;  %s548_s0 = int_to_ptr.vmem [resolvable:$false] %s547_s0 }
  0x2f   : > { %s549_s11 = scalar_lea.vmem %s548_s0, 192  ;;  %p550_p6 = scmp.lt.s32.totalorder %s182_s27, %s548_s0 }
  0x30   : > { %p545_p2 = pnand %p543_p8, %p531_p9  ;;  %p551_p10 = scmp.lt.s32.totalorder %s549_s11, %s542_s28 }
  0x32   : > { %p546_p5 = pneg %p545_p2  ;;  %p552_p11 = por %p551_p10, %p550_p6 }
  0x34   : > { %p553_p13 = pnand %p552_p11, %p546_p5 }
  0x36   : > { %556 = shalt.err (!%p553_p13)
}
  0x37   : > { %s650_s18 = smov 32   ;;  %s651_s20 = smov 2  }
  0x38   : > { %438 = dma.hbm_to_vmem [thread:$0]  (!%p743_p1), %s180_s30, 96, %s182_s27, %s170_s9, %s650_s18, %s650_s18, %s651_s20  }
  0x39   : > { %193 = sbr.rel (%p733_p12) target bundleno = 111 (0x6f), region = 32 }
  0x3e   : > { %608 = dma.done.wait (%p713_p3), [#allocation5], 16  }
  0x3f   : > { %610 = vsyncadd (%p713_p3), [#allocation5], 4294967280 }
  0x40   : > { %612 = dma.done.wait (%p713_p3), [#allocation6], 16  }
  0x41   : > { %614 = vsyncadd (%p713_p3), [#allocation6], 4294967280  ;;  %s792_s0 = sand.u32 1, %s629_s13  }
  0x42   : > { %s414_s25 = smul.u32 6, %s792_s0  ;;  %s204_s29 = scalar_lea.sflag [#allocation3], %s792_s0 }
  0x44   : > { %s207_s4 = scalar_lea.vmem [#allocation8], %s414_s25 }
  0x45   : > { %616 = dma.done.wait (%p719_p7), %s204_s29, 96  }
  0x46   : > { %618 = vsyncadd (%p719_p7), %s204_s29, 4294967200 }
  0x47   : > { %212 = sfence }
  0x48   : > { %v231_v0 = vld [vmem:[%s207_s4] sm:$0x3]  ;;  %v232_v1 = vld [vmem:[%s207_s4 + $0x2] sm:$0x3]  ;;  %v233_v2 = vld [vmem:[%s207_s4 + $0x4] sm:$0x3] }
  0x49   : > { %s406_s21 = sld [smem:[#allocation2 + $0x2]]  ;;  %v236_v3 = vmul.f32 0.2989, %v231_v0  ;;  %v237_v4 = vmul.f32 0.587, %v232_v1  ;;  %s230_s22 = scalar_lea.vmem [#allocation9], %s414_s25 }
  0x4a   : > { %v239_v5 = vmul.f32 0.114, %v233_v2  ;;  %s256_s19 = sld [smem:[#allocation2]]  ;;  %s287_s27 = sshll.u32 %s230_s22, 4  ;;  %s805_s27 = int_to_ptr.vmem [resolvable:$true] %s287_s27 }
  0x4b   : > { %v238_v6 = vadd.f32 %v237_v4, %v236_v3  ;;  %s415_s6 = smul.u32 96, %s637_s15  ;;  %s273_s15 = scalar_lea.sflag [#allocation4], %s792_s0 }
  0x4c   : > { %s557_s28 = scalar_lea.vmem %s805_s27, 96  ;;  %p871_p7 = scmp.ne.s32.totalorder %s865_s23, 0 }
  0x4d   : > { %v240_v7 = vadd.f32 %v239_v5, %v238_v6  ;;  %s810_s9 = scalar_lea.hbm %s860_s3, %s415_s6  ;;  %p558_p3 = scmp.ne.s32.totalorder %s805_s27, %s557_s28 }
  0x4e   : > { %s652_s10 = smov [#allocation9]  }
  0x4f   : > { %s235_s26 = ssub.f32 1.0, %s406_s21  ;;  %v243_v8 = vstv %s406_s21  ;;  %p559_p12 = pnand %p558_p3, %p871_p7 }
  0x50   : > { %v244_v9 = vmul.f32 %v243_v8, %v231_v0  ;;  %v248_v10 = vmul.f32 %v243_v8, %v232_v1  ;;  %v252_v11 = vmul.f32 %v243_v8, %v233_v2  ;;  %v257_v20 = vstv %s256_s19  ;;  %s561_s11 = sshll.u32 %s652_s10, 4  ;;  %s562_s11 = int_to_ptr.vmem [resolvable:$false] %s561_s11 }
  0x51   : > { %v241_v12 = vstv %s235_s26  ;;  %p560_p1 = pneg %p559_p12  ;;  %s563_s18 = scalar_lea.vmem %s562_s11, 192 }
  0x52   : > { %v242_v13 = vmul.f32 %v241_v12, %v240_v7  ;;  %p564_p0 = scmp.lt.s32.totalorder %s805_s27, %s562_s11  ;;  %p565_p4 = scmp.lt.s32.totalorder %s563_s18, %s557_s28 }
  0x54   : > { %v245_v14 = vadd.f32 %v244_v9, %v242_v13  ;;  %v249_v15 = vadd.f32 %v248_v10, %v242_v13  ;;  %v253_v16 = vadd.f32 %v252_v11, %v242_v13  ;;  %p566_p9 = por %p565_p4, %p564_p0 }
  0x56   : > { %v246_v17 = vmax.f32 %v245_v14, 0.0  ;;  %v250_v18 = vmax.f32 %v249_v15, 0.0  ;;  %v254_v19 = vmax.f32 %v253_v16, 0.0  ;;  %p567_p8 = pnand %p566_p9, %p560_p1 }
  0x58   : > { %v247_v21 = vmin.f32 %v246_v17, 1.0  ;;  %v251_v22 = vmin.f32 %v250_v18, 1.0  ;;  %v255_v23 = vmin.f32 %v254_v19, 1.0 }
  0x5a   : > { %v258_v24 = vmul.f32 %v257_v20, %v247_v21  ;;  %v261_v25 = vmul.f32 %v257_v20, %v251_v22  ;;  %v264_v26 = vmul.f32 %v257_v20, %v255_v23 }
  0x5c   : > { %v259_v27 = vmax.f32 %v258_v24, 0.0  ;;  %v262_v28 = vmax.f32 %v261_v25, 0.0  ;;  %v265_v29 = vmax.f32 %v264_v26, 0.0 }
  0x5e   : > { %v260_v30 = vmin.f32 %v259_v27, 1.0  ;;  %v263_v31 = vmin.f32 %v262_v28, 1.0  ;;  %v266_v32 = vmin.f32 %v265_v29, 1.0 }
  0x60   : > { %267 = vst [vmem:[%s230_s22] sm:$0x3] %v260_v30  ;;  %407 = vst [vmem:[%s230_s22 + $0x2] sm:$0x3] %v263_v31 }
  0x61   : > { %408 = vst [vmem:[%s230_s22 + $0x4] sm:$0x3] %v266_v32 }
  0x62   : > { %570 = shalt.err (!%p567_p8)
}
  0x63   : > { %s571_s20 = scalar_lea.hbm %s810_s9, 96  ;;  %s575_s4 = scalar_lea.hbm %s860_s3, 384 }
  0x64   : > { %p572_p2 = scmp.ne.s32.totalorder %s810_s9, %s571_s20  ;;  %p576_p10 = scmp.lt.s32.totalorder %s810_s9, %s860_s3 }
  0x65   : > { %p577_p11 = scmp.lt.s32.totalorder %s575_s4, %s571_s20 }
  0x66   : > { %p573_p5 = pnand %p572_p2, %p871_p7 }
  0x67   : > { %p578_p13 = por %p577_p11, %p576_p10 }
  0x68   : > { %p574_p6 = pneg %p573_p5 }
  0x6a   : > { %p579_p3 = pnand %p578_p13, %p574_p6 }
  0x6c   : > { %582 = shalt.err (!%p579_p3)
}
  0x6d   : > { %s653_s26 = smov 32   ;;  %s654_s22 = smov 2  }
  0x6e   : > { %426 = dma.vmem_to_hbm [thread:$0]  (%p871_p7), %s805_s27, 96, %s810_s9, %s273_s15, %s653_s26, %s653_s26, %s654_s22  }
  0x6f PF: > { %p448_p12 = scmp.ge.s32.totalorder %s645_s17, 2  ;;  %s302_s6 = sand.u32 1, %s625_s12  }
  0x70   : > { %p872_p1 = scmp.ne.s32.totalorder %s866_s24, 0  ;;  %s303_s7 = scalar_lea.sflag [#allocation4], %s302_s6 }
  0x72   : > { %p440_p0 = pnand %p448_p12, %p872_p1 }
  0x74   : > { %p441_p4 = pneg %p440_p0 }
  0x76   : > { %620 = dma.done.wait (%p441_p4), %s303_s7, 96  }
  0x77   : > { %622 = vsyncadd (%p441_p4), %s303_s7, 4294967200  ;;  %s21_s17 = sadd.s32 1, %s645_s17   ;;  %s873_s12 = smov %s629_s13 }
  0x78   : > { %p18_p9 = scmp.ge.s32.totalorder %s21_s17, 6   ;;  %s874_s13 = smov %s633_s14 }
  0x79   : > { %s875_s14 = smov %s775_s8  ;;  %s876_s15 = smov %s641_s16 }
  0x7a   : > { %s877_s16 = smov %s879_s5  ;;  %20 = sbr.rel (!%p18_p9) target bundleno = 10 (0xa), region = 89 }
  0x7f   :  { %308 = vsyncpa [#allocation3], 1 }
  0x80   :  { %310 = vsyncpa [#allocation3 + $0x1], 1 }
  0x81   :  { %311 = vsyncpa [#allocation4], 1 }
  0x82   :  { %313 = vsyncpa [#allocation4 + $0x1], 1 }
  0x83   :  { %314 = vsyncpa [#allocation5], 1 }
  0x84   :  { %316 = vsyncpa [#allocation5 + $0x1], 1 }
  0x85   :  { %317 = vsyncpa [#allocation6], 1 }
  0x86   :  { %319 = vsyncpa [#allocation6 + $0x1], 1 }

</bundles_post_ra>
